<compile_context>
chip_gen: v7x
topology: tpu7x:2x2x1
jax: 0.10.0
libtpu: 0.0.40
codegen_flags: <defaults>
</compile_context>

<pallas_src>
import jax
import jax.numpy as jnp
import numpy as np
from jax.experimental import pallas as pl
from jax.experimental.pallas import tpu as pltpu

IN_FEATURES = 1080
D1, D2, D3 = 128, 64, 32
OUT_FEATURES = 2
LANE = 128

# Row layout of the packed-constants array `wc` (f32, [PACK_ROWS, 128]).
# Every section starts on a multiple-of-8 (sublane-aligned) row.
W2_ROW = 0            # rows [  0,128): W2  [128, 64] in cols [0, 64)
W3_ROW = D1           # rows [128,192): W3  [ 64, 32] in cols [0, 32)
W4_ROW = D1 + D2      # rows [192,224): W4  [ 32,128] (head padded to 128 lanes)
B1_ROW = 224          # row 224: folded b1 (128)
B2_ROW = 232          # row 232: folded b2 ( 64)
B3_ROW = 240          # row 240: folded b3 ( 32)
B4_ROW = 248          # row 248: b4 padded to 128 lanes
PACK_ROWS = 256


def _round_up(x, m):
    return ((x + m - 1) // m) * m


def _pick_tm(b_pad, max_tile):
    """Largest multiple-of-8 divisor of b_pad that is <= max_tile, preferring >=2 grid
    steps when the batch allows it (so v7x's two TensorCores both get work)."""
    target = min(max_tile, b_pad)
    if b_pad >= 16:
        target = min(target, max(8, b_pad // 2))
    target -= target % 8
    target = max(target, 8)
    tm = target
    while b_pad % tm:
        tm -= 8
    return tm


# --------------------------------------------------------------------------------------
# Kernel: one batch tile of the fully-fused MLP.
#   x_ref  : [tm, 1080]  (f32 or bf16)
#   w1_ref : [1080, 128] bf16  (VMEM-resident; constant index_map)
#   wc_ref : [256, 128]  f32   (packed W2/W3/W4 + biases; VMEM-resident)
#   out_ref: [tm, 128]   bf16  (lane-dense; cols >=2 are zero padding)
# --------------------------------------------------------------------------------------
def _mlp_kernel(x_ref, w1_ref, wc_ref, out_ref):
    def leaky_relu(h):
        return jnp.where(h > 0, h, 0.2 * h)

    x = x_ref[...]
    if x.dtype != jnp.bfloat16:
        # bf16 x is the fast path (pass bf16 from the caller to halve the HBM read);
        # for f32 x this one cast is hidden under the x DMA and avoids the (wrong-way)
        # implicit upcast of W1 that a mixed-dtype dot would trigger.
        x = x.astype(jnp.bfloat16)

    # fc_1 (+ folded fc_1_bn): bf16 x bf16 -> f32 accumulate, single-pass MXU path.
    b1 = wc_ref[B1_ROW:B1_ROW + 1, :]                                 # (1, 128) f32
    h = leaky_relu(jnp.dot(x, w1_ref[...],
                           preferred_element_type=jnp.float32) + b1)  # (tm, 128) f32

    # fc_2 (+ folded fc_2_bn)
    w2 = wc_ref[W2_ROW:W2_ROW + D1, :D2]                              # (128, 64)
    b2 = wc_ref[B2_ROW:B2_ROW + 1, :D2]                               # (1, 64)
    h = leaky_relu(jnp.dot(h, w2, preferred_element_type=jnp.float32) + b2)

    # fc_2b (+ folded fc_2b_bn)
    w3 = wc_ref[W3_ROW:W3_ROW + D2, :D3]                              # (64, 32)
    b3 = wc_ref[B3_ROW:B3_ROW + 1, :D3]                               # (1, 32)
    h = leaky_relu(jnp.dot(h, w3, preferred_element_type=jnp.float32) + b3)

    # fc_3 head, padded to 128 output lanes -> lane-dense store.
    w4 = wc_ref[W4_ROW:W4_ROW + D3, :]                                # (32, 128)
    b4 = wc_ref[B4_ROW:B4_ROW + 1, :]                                 # (1, 128)
    y = jnp.dot(h, w4, preferred_element_type=jnp.float32) + b4
    out_ref[...] = y.astype(out_ref.dtype)


# --------------------------------------------------------------------------------------
# One-time, host-side parameter preparation (NOT on the per-call path).
# --------------------------------------------------------------------------------------
def prepare_params(params, eps=1e-5):
    """Fold eval-mode BN + Linear bias into (W, b); transpose; pack constants."""

    def fold(w, b, bn_p):
        gamma, beta, mean, var = bn_p
        scale = gamma / jnp.sqrt(var + eps)
        shift = beta - mean * scale
        w_f = (w.T * scale[None, :]).astype(jnp.float32)   # [in, out]
        b_f = (b * scale + shift).astype(jnp.float32)      # [out]
        return w_f, b_f

    w1, b1 = fold(params['w1'], params['b1'], params['bn1'])   # (1080,128), (128,)
    w2, b2 = fold(params['w2'], params['b2'], params['bn2'])   # (128, 64), ( 64,)
    w3, b3 = fold(params['w3'], params['b3'], params['bn3'])   # ( 64, 32), ( 32,)
    w4 = params['w4'].T.astype(jnp.float32)                    # ( 32,  2)
    b4 = params['b4'].astype(jnp.float32)                      # (  2,)

    # Dominant weight stored bf16 (single-pass MXU operand, half the one-time DMA).
    w1_bf16 = w1.astype(jnp.bfloat16)

    # Pack every small constant into one f32 [256, 128] block (one DMA, VMEM-resident).
    wc = jnp.zeros((PACK_ROWS, LANE), jnp.float32)
    wc = wc.at[W2_ROW:W2_ROW + D1, :D2].set(w2)
    wc = wc.at[W3_ROW:W3_ROW + D2, :D3].set(w3)
    wc = wc.at[W4_ROW:W4_ROW + D3, :OUT_FEATURES].set(w4)
    wc = wc.at[B1_ROW, :D1].set(b1)
    wc = wc.at[B2_ROW, :D2].set(b2)
    wc = wc.at[B3_ROW, :D3].set(b3)
    wc = wc.at[B4_ROW, :OUT_FEATURES].set(b4)

    return dict(w1=w1_bf16, wc=wc)


# --------------------------------------------------------------------------------------
# Forward wrapper (jit-able; prep arrays are plain jit args, already prepared).
# --------------------------------------------------------------------------------------
def linear_policy_bn_forward(x, prep, *, batch_tile=1024):
    B = x.shape[0]
    b_pad = _round_up(B, 8)              # pad batch only to a multiple of 8
    tm = _pick_tm(b_pad, batch_tile)

    if b_pad != B:                        # tiny row pad only when needed (<=7 rows)
        x = jnp.pad(x, ((0, b_pad - B), (0, 0)))

    const = lambda i: (0, 0)              # weights: same block every step -> resident

    # VMEM budget (v7x scoped default is 32 MiB); only raise the limit if needed.
    est_vmem = (2 * tm * IN_FEATURES * x.dtype.itemsize   # double-buffered x tiles
                + 2 * tm * LANE * 2                        # double-buffered bf16 out
                + IN_FEATURES * D1 * 2                     # W1 (bf16)
                + PACK_ROWS * LANE * 4)                    # packed constants
    cp_kwargs = dict(dimension_semantics=("parallel",))
    if est_vmem > 30 * 1024 * 1024:
        cp_kwargs["vmem_limit_bytes"] = min(int(est_vmem * 5 // 4), 60 * 1024 * 1024)

    y = pl.pallas_call(
        _mlp_kernel,
        out_shape=jax.ShapeDtypeStruct((b_pad, LANE), jnp.bfloat16),
        grid=(b_pad // tm,),
        in_specs=[
            pl.BlockSpec((tm, IN_FEATURES), lambda i: (i, 0)),   # x tile (unpadded K)
            pl.BlockSpec((IN_FEATURES, D1), const),              # W1 (bf16, resident)
            pl.BlockSpec((PACK_ROWS, LANE), const),              # packed consts
        ],
        out_specs=pl.BlockSpec((tm, LANE), lambda i: (i, 0)),
        compiler_params=pltpu.CompilerParams(**cp_kwargs),
    )(x, prep['w1'], prep['wc'])

    y = y[:B, :OUT_FEATURES].astype(jnp.float32)
    return y[:, 0], y[:, 1]


# --------------------------------------------------------------------------------------
# Reference (pure JAX, unfolded) and deterministic parameter init.
# --------------------------------------------------------------------------------------
def _reference_forward(x, params, eps=1e-5):
    def bn(h, bn_p):
        gamma, beta, mean, var = bn_p
        return (h - mean) / jnp.sqrt(var + eps) * gamma + beta

    def lrelu(h):
        return jnp.where(h > 0, h, 0.2 * h)

    h = lrelu(bn(x @ params['w1'].T + params['b1'], params['bn1']))
    h = lrelu(bn(h @ params['w2'].T + params['b2'], params['bn2']))
    h = lrelu(bn(h @ params['w3'].T + params['b3'], params['bn3']))
    y = h @ params['w4'].T + params['b4']
    return y[:, 0], y[:, 1]


def init_params(key, dims=(D1, D2, D3), in_features=IN_FEATURES):
    """nn.Linear / nn.BatchNorm1d shaped params with PyTorch-style init."""
    params = {}
    layer_dims = [(in_features, dims[0]), (dims[0], dims[1]),
                  (dims[1], dims[2]), (dims[2], OUT_FEATURES)]
    keys = jax.random.split(key, 16)
    k_i = 0
    for idx, (fan_in, fan_out) in enumerate(layer_dims, start=1):
        bound = 1.0 / jnp.sqrt(jnp.float32(fan_in))
        params[f'w{idx}'] = jax.random.uniform(
            keys[k_i], (fan_out, fan_in), minval=-bound, maxval=bound, dtype=jnp.float32)
        k_i += 1
        params[f'b{idx}'] = jax.random.uniform(
            keys[k_i], (fan_out,), minval=-bound, maxval=bound, dtype=jnp.float32)
        k_i += 1

    for idx, nfeat in enumerate(dims, start=1):
        gamma = 1.0 + 0.1 * jax.random.normal(keys[k_i], (nfeat,), dtype=jnp.float32)
        k_i += 1
        beta = 0.1 * jax.random.normal(keys[k_i], (nfeat,), dtype=jnp.float32)
        k_i += 1
        running_mean = 0.05 * jnp.arange(nfeat, dtype=jnp.float32) / nfeat
        running_var = 1.0 + 0.02 * jnp.arange(nfeat, dtype=jnp.float32) / nfeat
        params[f'bn{idx}'] = (gamma, beta, running_mean, running_var)

    return params


if __name__ == "__main__":
    key = jax.random.PRNGKey(0)
    k_param, k_x = jax.random.split(key)

    params = init_params(k_param)
    prep = prepare_params(params)          # one-time prep, outside the per-call path

    fwd = jax.jit(linear_policy_bn_forward, static_argnames=("batch_tile",))

    # Small single-tile case.
    B = 8
    x = jax.random.normal(k_x, (B, IN_FEATURES), dtype=jnp.float32)
    angle, throttle = fwd(x, prep)
    jax.block_until_ready((angle, throttle))
    assert angle.shape == (B,) and throttle.shape == (B,)

    ref_angle, ref_throttle = _reference_forward(x, params)
    np.testing.assert_allclose(np.asarray(angle), np.asarray(ref_angle),
                               rtol=5e-2, atol=5e-2)
    np.testing.assert_allclose(np.asarray(throttle), np.asarray(ref_throttle),
                               rtol=5e-2, atol=5e-2)

    # Multi-grid-step case (exercises the batch grid, tile picker, "parallel" axis).
    B2 = 48
    x2 = jax.random.normal(jax.random.PRNGKey(1), (B2, IN_FEATURES), dtype=jnp.float32)
    a2, t2 = fwd(x2, prep, batch_tile=16)
    jax.block_until_ready((a2, t2))
    ra2, rt2 = _reference_forward(x2, params)
    np.testing.assert_allclose(np.asarray(a2), np.asarray(ra2), rtol=5e-2, atol=5e-2)
    np.testing.assert_allclose(np.asarray(t2), np.asarray(rt2), rtol=5e-2, atol=5e-2)

    print("KERNEL_OK")
</pallas_src>

<mosaic_0001>
module attributes {stable_mosaic.version = 11 : i64} {
  func.func @_mlp_kernel(%arg0: i32, %arg1: memref<8x1080xf32, #tpu.memory_space<vmem>>, %arg2: memref<1080x128xbf16, #tpu.memory_space<vmem>>, %arg3: memref<256x128xf32, #tpu.memory_space<vmem>>, %arg4: memref<8x128xbf16, #tpu.memory_space<vmem>>) attributes {dimension_semantics = [#tpu.dimension_semantics<parallel>], iteration_bounds = array<i64: 1>, scalar_prefetch = 0 : i64, scratch_operands = 0 : i64, tpu.core_type = #tpu.core_type<tc>, window_params = [{transform_indices = @transform_0, window_bounds = array<i64: 8, 1080>}, {pipeline_mode = #tpu.pipeline_mode<synchronous>, transform_indices = @transform_1, window_bounds = array<i64: 1080, 128>}, {pipeline_mode = #tpu.pipeline_mode<synchronous>, transform_indices = @transform_2, window_bounds = array<i64: 256, 128>}, {transform_indices = @transform_3, window_bounds = array<i64: 8, 128>}]} {
    %c0 = arith.constant 0 : index
    %c0_0 = arith.constant 0 : index
    %0 = vector.load %arg1[%c0, %c0_0] : memref<8x1080xf32, #tpu.memory_space<vmem>>, vector<8x1080xf32>
    %1 = arith.truncf %0 : vector<8x1080xf32> to vector<8x1080xbf16>
    %c224 = arith.constant 224 : index
    %c0_1 = arith.constant 0 : index
    %2 = vector.load %arg3[%c224, %c0_1] : memref<256x128xf32, #tpu.memory_space<vmem>>, vector<1x128xf32>
    %c0_2 = arith.constant 0 : index
    %c0_3 = arith.constant 0 : index
    %3 = vector.load %arg2[%c0_2, %c0_3] : memref<1080x128xbf16, #tpu.memory_space<vmem>>, vector<1080x128xbf16>
    %cst = arith.constant dense<0.000000e+00> : vector<8x128xf32>
    %4 = tpu.matmul %1, %3, %cst {dimension_numbers = #tpu.dot_dimension_numbers<[1], [0], [0], [1], [0, 0, 1, 1], [], []>} : vector<8x1080xbf16>, vector<1080x128xbf16>, vector<8x128xf32> -> vector<8x128xf32>
    %5 = vector.broadcast %2 : vector<1x128xf32> to vector<8x128xf32>
    %6 = arith.addf %4, %5 : vector<8x128xf32>
    %cst_4 = arith.constant 0.000000e+00 : f32
    %7 = vector.broadcast %cst_4 : f32 to vector<8x128xf32>
    %8 = arith.cmpf ogt, %6, %7 : vector<8x128xf32>
    %cst_5 = arith.constant 2.000000e-01 : f32
    %9 = vector.broadcast %cst_5 : f32 to vector<8x128xf32>
    %10 = arith.mulf %9, %6 : vector<8x128xf32>
    %11 = arith.select %8, %6, %10 : vector<8x128xi1>, vector<8x128xf32>
    %c0_6 = arith.constant 0 : index
    %c0_7 = arith.constant 0 : index
    %12 = vector.load %arg3[%c0_6, %c0_7] : memref<256x128xf32, #tpu.memory_space<vmem>>, vector<128x64xf32>
    %c232 = arith.constant 232 : index
    %c0_8 = arith.constant 0 : index
    %13 = vector.load %arg3[%c232, %c0_8] : memref<256x128xf32, #tpu.memory_space<vmem>>, vector<1x64xf32>
    %cst_9 = arith.constant dense<0.000000e+00> : vector<8x64xf32>
    %14 = tpu.matmul %11, %12, %cst_9 {dimension_numbers = #tpu.dot_dimension_numbers<[1], [0], [0], [1], [0, 0, 1, 1], [], []>} : vector<8x128xf32>, vector<128x64xf32>, vector<8x64xf32> -> vector<8x64xf32>
    %15 = vector.broadcast %13 : vector<1x64xf32> to vector<8x64xf32>
    %16 = arith.addf %14, %15 : vector<8x64xf32>
    %cst_10 = arith.constant 0.000000e+00 : f32
    %17 = vector.broadcast %cst_10 : f32 to vector<8x64xf32>
    %18 = arith.cmpf ogt, %16, %17 : vector<8x64xf32>
    %cst_11 = arith.constant 2.000000e-01 : f32
    %19 = vector.broadcast %cst_11 : f32 to vector<8x64xf32>
    %20 = arith.mulf %19, %16 : vector<8x64xf32>
    %21 = arith.select %18, %16, %20 : vector<8x64xi1>, vector<8x64xf32>
    %c128 = arith.constant 128 : index
    %c0_12 = arith.constant 0 : index
    %22 = vector.load %arg3[%c128, %c0_12] : memref<256x128xf32, #tpu.memory_space<vmem>>, vector<64x32xf32>
    %c240 = arith.constant 240 : index
    %c0_13 = arith.constant 0 : index
    %23 = vector.load %arg3[%c240, %c0_13] : memref<256x128xf32, #tpu.memory_space<vmem>>, vector<1x32xf32>
    %cst_14 = arith.constant dense<0.000000e+00> : vector<8x32xf32>
    %24 = tpu.matmul %21, %22, %cst_14 {dimension_numbers = #tpu.dot_dimension_numbers<[1], [0], [0], [1], [0, 0, 1, 1], [], []>} : vector<8x64xf32>, vector<64x32xf32>, vector<8x32xf32> -> vector<8x32xf32>
    %25 = vector.broadcast %23 : vector<1x32xf32> to vector<8x32xf32>
    %26 = arith.addf %24, %25 : vector<8x32xf32>
    %cst_15 = arith.constant 0.000000e+00 : f32
    %27 = vector.broadcast %cst_15 : f32 to vector<8x32xf32>
    %28 = arith.cmpf ogt, %26, %27 : vector<8x32xf32>
    %cst_16 = arith.constant 2.000000e-01 : f32
    %29 = vector.broadcast %cst_16 : f32 to vector<8x32xf32>
    %30 = arith.mulf %29, %26 : vector<8x32xf32>
    %31 = arith.select %28, %26, %30 : vector<8x32xi1>, vector<8x32xf32>
    %c192 = arith.constant 192 : index
    %c0_17 = arith.constant 0 : index
    %32 = vector.load %arg3[%c192, %c0_17] : memref<256x128xf32, #tpu.memory_space<vmem>>, vector<32x128xf32>
    %c248 = arith.constant 248 : index
    %c0_18 = arith.constant 0 : index
    %33 = vector.load %arg3[%c248, %c0_18] : memref<256x128xf32, #tpu.memory_space<vmem>>, vector<1x128xf32>
    %cst_19 = arith.constant dense<0.000000e+00> : vector<8x128xf32>
    %34 = tpu.matmul %31, %32, %cst_19 {dimension_numbers = #tpu.dot_dimension_numbers<[1], [0], [0], [1], [0, 0, 1, 1], [], []>} : vector<8x32xf32>, vector<32x128xf32>, vector<8x128xf32> -> vector<8x128xf32>
    %35 = vector.broadcast %33 : vector<1x128xf32> to vector<8x128xf32>
    %36 = arith.addf %34, %35 : vector<8x128xf32>
    %37 = arith.truncf %36 : vector<8x128xf32> to vector<8x128xbf16>
    %c0_20 = arith.constant 0 : index
    %c0_21 = arith.constant 0 : index
    %38 = vector.load %arg4[%c0_20, %c0_21] : memref<8x128xbf16, #tpu.memory_space<vmem>>, vector<8x128xbf16>
    tpu.vector_store %arg4[%c0_20, %c0_21], %37 {strides = array<i32>} : memref<8x128xbf16, #tpu.memory_space<vmem>>, vector<8x128xbf16>,
    return
  }
  func.func @transform_0(%arg0: i32) -> (i32, i32) {
    %c0_i32 = arith.constant 0 : i32
    %c0_i32_0 = arith.constant 0 : i32
    return %arg0, %c0_i32 : i32, i32
  }
  func.func @transform_1(%arg0: i32) -> (i32, i32) {
    %c0_i32 = arith.constant 0 : i32
    %c0_i32_0 = arith.constant 0 : i32
    %c0_i32_1 = arith.constant 0 : i32
    return %c0_i32, %c0_i32_0 : i32, i32
  }
  func.func @transform_2(%arg0: i32) -> (i32, i32) {
    %c0_i32 = arith.constant 0 : i32
    %c0_i32_0 = arith.constant 0 : i32
    %c0_i32_1 = arith.constant 0 : i32
    return %c0_i32, %c0_i32_0 : i32, i32
  }
  func.func @transform_3(%arg0: i32) -> (i32, i32) {
    %c0_i32 = arith.constant 0 : i32
    %c0_i32_0 = arith.constant 0 : i32
    return %arg0, %c0_i32 : i32, i32
  }
}

</mosaic_0001>

<bundles_post_ra>
// kernel: linear_policy_bn_forward.1
= control target key start
LH: loop header
LB: loop body
LE: loop exit
PB: predicated region body
PF: predicated region fallthrough
CT: control target
= control target key end

     0   :  { %8 = vsyncpa [#allocation3], 0  ;;  %s1664_s0 = inlined_call_operand.hbm [shape: f32[8,1080], index: 0, kind: input, shape index: {}]   ;;  %s1665_s1 = inlined_call_operand.hbm [shape: bf16[1080,128], index: 1, kind: input, shape index: {}]   ;;  %s1666_s2 = inlined_call_operand.hbm [shape: f32[256,128], index: 2, kind: input, shape index: {}]   ;;  %s1667_s3 = inlined_call_operand.vmem [shape: bf16[8,128], index: 3, kind: output, shape index: {}]  }
   0x1   :  { %9 = vsyncpa [#allocation5], 0  ;;  %s1569_s12 = smov [#allocation4]   ;;  %s1499_s16 = scalar_lea.hbm %s1665_s1, 8640 }
   0x2   :  { %s25_s13 = sshll.u32 %s1569_s12, 4  ;;  %p1500_p0 = scmp.ne.s32.totalorder %s1665_s1, %s1499_s16  ;;  %s26_s13 = int_to_ptr.vmem [resolvable:$true] %s25_s13 }
   0x3   :  { %p1503_p1 = scmp.lt.u32.totalorder %s1499_s16, %s1665_s1 }
   0x5   :  { %p1505_p2 = pnand %p1503_p1, %p1500_p0 }
   0x7   :  { %1508 = shalt.err (!%p1505_p2)
}
   0x8   :  { %s1509_s21 = scalar_lea.vmem %s26_s13, 8640  ;;  %p1514_p4 = scmp.lt.s32.totalorder %s26_s13, %s26_s13 }
   0x9   :  { %p1510_p3 = scmp.ne.s32.totalorder %s26_s13, %s1509_s21  ;;  %p1515_p5 = scmp.lt.s32.totalorder %s1509_s21, %s1509_s21 }
   0xb   :  { %p1516_p6 = por %p1515_p5, %p1514_p4 }
   0xd   :  { %p1517_p7 = pnand %p1516_p6, %p1510_p3 }
   0xf   :  { %1520 = shalt.err (!%p1517_p7)
}
  0x10   :  { %s1570_s22 = smov 64   ;;  %s1571_s23 = smov 4  }
  0x11   :  { %31 = dma.hbm_to_vmem [thread:$0]  %s1665_s1, 8640, %s26_s13, [#allocation5], %s1570_s22, %s1570_s22, %s1571_s23  }
  0x12   :  { %s1572_s26 = smov [#allocation2]   ;;  %s1573_s28 = smov [#allocation6]  }
  0x13   :  { %s16_s27 = sshll.u32 %s1572_s26, 4  ;;  %s37_s29 = sshll.u32 %s1573_s28, 4  ;;  %s17_s27 = int_to_ptr.vmem [resolvable:$true] %s16_s27  ;;  %s38_s29 = int_to_ptr.vmem [resolvable:$true] %s37_s29 }
  0x14   :  { %s1521_s5 = scalar_lea.hbm %s1664_s0, 1152 }
  0x15   :  { %p1522_p8 = scmp.ne.s32.totalorder %s1664_s0, %s1521_s5  ;;  %p1525_p9 = scmp.lt.u32.totalorder %s1521_s5, %s1664_s0 }
  0x17   :  { %p1527_p10 = pnand %p1525_p9, %p1522_p8 }
  0x19   :  { %1530 = shalt.err (!%p1527_p10)
}
  0x1a   :  { %s1531_s1 = scalar_lea.vmem %s17_s27, 1152  ;;  %p1536_p12 = scmp.lt.s32.totalorder %s17_s27, %s17_s27 }
  0x1b   :  { %p1532_p11 = scmp.ne.s32.totalorder %s17_s27, %s1531_s1  ;;  %p1537_p13 = scmp.lt.s32.totalorder %s1531_s1, %s1531_s1 }
  0x1d   :  { %p1538_p0 = por %p1537_p13, %p1536_p12 }
  0x1f   :  { %p1539_p1 = pnand %p1538_p0, %p1532_p11 }
  0x21   :  { %1542 = shalt.err (!%p1539_p1)
}
  0x22   :  { %19 = dma.hbm_to_vmem [thread:$0]  %s1664_s0, 1152, %s17_s27, [#allocation3]  }
  0x23   :  { %s1543_s14 = scalar_lea.hbm %s1666_s2, 4096 }
  0x24   :  { %p1544_p2 = scmp.ne.s32.totalorder %s1666_s2, %s1543_s14  ;;  %p1547_p3 = scmp.lt.u32.totalorder %s1543_s14, %s1666_s2 }
  0x26   :  { %p1549_p4 = pnand %p1547_p3, %p1544_p2 }
  0x28   :  { %1552 = shalt.err (!%p1549_p4)
}
  0x29   :  { %s1553_s19 = scalar_lea.vmem %s38_s29, 4096  ;;  %p1558_p6 = scmp.lt.s32.totalorder %s38_s29, %s38_s29 }
  0x2a   :  { %p1554_p5 = scmp.ne.s32.totalorder %s38_s29, %s1553_s19  ;;  %p1559_p7 = scmp.lt.s32.totalorder %s1553_s19, %s1553_s19 }
  0x2c   :  { %p1560_p8 = por %p1559_p7, %p1558_p6 }
  0x2e   :  { %p1561_p9 = pnand %p1560_p8, %p1554_p5 }
  0x30   :  { %1564 = shalt.err (!%p1561_p9)
}
  0x31   :  { %s1574_s0 = smov 128   ;;  %s1575_s20 = smov 8  }
  0x32   :  { %43 = dma.hbm_to_vmem [thread:$0]  %s1666_s2, 4096, %s38_s29, [#allocation5], %s1574_s0, %s1574_s0, %s1575_s20  }
  0x33   :  { %1565 = dma.done.wait [#allocation3], 1152  }
  0x34   :  { %1566 = vsyncadd [#allocation3], 4294966144 }
  0x35   :  { %1567 = dma.done.wait [#allocation5], 12736  }
  0x36   :  { %1568 = vsyncadd [#allocation5], 4294954560  ;;  %v1431_v0 = vld [vmem:[#allocation4 + $0x40] sm:$0xff]   ;;  %v1435_v4 = vld [vmem:[#allocation4 + $0x48] sm:$0xff]   ;;  %vm1577_vm0 = vmmov 0   ;;  %vm621_vm1 = vcmask 1043456  }
  0x37   :  { %v1432_v1 = vld [vmem:[#allocation4] sm:$0xff]   ;;  %1178 = vmatprep.subr.bf16.mxu0 %v1431_v0  ;;  %v1436_v5 = vld [vmem:[#allocation4 + $0x8] sm:$0xff]   ;;  %v1439_v8 = vld [vmem:[#allocation4 + $0x50] sm:$0xff]   ;;  %vm617_vm2 = vcmask 457728   ;;  %vm935_vm5 = vcmask 523264   ;;  %vm1021_vm7 = vcmask 261120  }
  0x38   :  { %v1433_v2 = vld [vmem:[#allocation4 + $0xc0] sm:$0xff]   ;;  %1179 = vmatpush3.bf16.msra.mxu0 %v1432_v1  ;;  %v1437_v6 = vld [vmem:[#allocation4 + $0xc8] sm:$0xff]   ;;  %v1440_v9 = vld [vmem:[#allocation4 + $0x10] sm:$0xff]  }
  0x39   :  { %v1434_v3 = vld [vmem:[#allocation4 + $0x80] sm:$0xff]   ;;  %1200 = vmatprep.subr.bf16.mxu1 %v1433_v2  ;;  %1180 = vmatprep.subr.bf16.mxu0 %v1435_v4  ;;  %v1438_v7 = vld [vmem:[#allocation4 + $0x88] sm:$0xff]   ;;  %v1441_v10 = vld [vmem:[#allocation4 + $0xd0] sm:$0xff]  }
  0x3a   :  { %1201 = vmatpush3.bf16.msra.mxu1 %v1434_v3  ;;  %v1442_v11 = vld [vmem:[#allocation4 + $0x90] sm:$0xff]   ;;  %v1443_v12 = vld [vmem:[#allocation4 + $0x58] sm:$0xff]   ;;  %v1447_v16 = vld [vmem:[#allocation4 + $0x60] sm:$0xff]  }
  0x3b   :  { %1202 = vmatprep.subr.bf16.mxu1 %v1437_v6  ;;  %v1444_v13 = vld [vmem:[#allocation4 + $0x18] sm:$0xff]   ;;  %v1448_v17 = vld [vmem:[#allocation4 + $0x20] sm:$0xff]   ;;  %v1451_v20 = vld [vmem:[#allocation4 + $0x68] sm:$0xff]  }
  0x3c   :  { %1181 = vmatpush3.bf16.msra.mxu0 %v1436_v5  ;;  %v1445_v14 = vld [vmem:[#allocation4 + $0xd8] sm:$0xff]   ;;  %v1449_v18 = vld [vmem:[#allocation4 + $0xe0] sm:$0xff]   ;;  %v1452_v21 = vld [vmem:[#allocation4 + $0x28] sm:$0xff]  }
  0x3d   :  { %1182 = vmatprep.subr.bf16.mxu0 %v1439_v8  ;;  %v1446_v15 = vld [vmem:[#allocation4 + $0x98] sm:$0xff]   ;;  %v1450_v19 = vld [vmem:[#allocation4 + $0xa0] sm:$0xff]   ;;  %v1453_v22 = vld [vmem:[#allocation4 + $0xe8] sm:$0xff]  }
  0x3e   :  { %1203 = vmatpush3.bf16.msra.mxu1 %v1438_v7  ;;  %v1454_v23 = vld [vmem:[#allocation4 + $0xa8] sm:$0xff]   ;;  %v1455_v24 = vld [vmem:[#allocation4 + $0x70] sm:$0xff]   ;;  %v1459_v28 = vld [vmem:[#allocation4 + $0x78] sm:$0xff]  }
  0x3f   :  { %1204 = vmatprep.subr.bf16.mxu1 %v1441_v10  ;;  %v1456_v25 = vld [vmem:[#allocation4 + $0x30] sm:$0xff]   ;;  %v1460_v29 = vld [vmem:[#allocation4 + $0x38] sm:$0xff]   ;;  %v55_v31 = vld [vmem:[#allocation2 + $0x8] sm:$0xff] }
  0x40   :  { %1183 = vmatpush3.bf16.msra.mxu0 %v1440_v9  ;;  %v1457_v26 = vld [vmem:[#allocation4 + $0xf0] sm:$0xff]   ;;  %v1461_v30 = vld [vmem:[#allocation4 + $0xf8] sm:$0xff]   ;;  %v64_v32 = vpack.c.bf16 %v55_v31, %v55_v31  ;;  %v1463_v36 = vld [vmem:[#allocation4 + $0x140] sm:$0xff]  }
  0x41   :  { %1184 = vmatprep.subr.bf16.mxu0 %v1443_v12  ;;  %v1458_v27 = vld [vmem:[#allocation4 + $0xb0] sm:$0xff]   ;;  %v1462_v33 = vld [vmem:[#allocation4 + $0xb8] sm:$0xff]   ;;  %v1464_v39 = vld [vmem:[#allocation4 + $0x100] sm:$0xff]   ;;  %v1576_v12 = vmov 0.0  }
  0x42   :  { %1205 = vmatpush3.bf16.msra.mxu1 %v1442_v11  ;;  %v54_v34 = vld [vmem:[#allocation2] sm:$0xff]  ;;  %v57_v37 = vld [vmem:[#allocation2 + $0x18] sm:$0xff]  ;;  %657 = vmatprep.mubr.bf16.mxu0 %v64_v32  ;;  %v56_v40 = vld [vmem:[#allocation2 + $0x10] sm:$0xff] }
  0x43   :  { %1206 = vmatprep.subr.bf16.mxu1 %v1445_v14  ;;  %v63_v35 = vpack.c.bf16 %v54_v34, %v54_v34  ;;  %v66_v38 = vpack.c.bf16 %v57_v37, %v57_v37  ;;  %v65_v41 = vpack.c.bf16 %v56_v40, %v56_v40  ;;  %v1465_v42 = vld [vmem:[#allocation4 + $0x1c0] sm:$0xff]   ;;  %v1467_v44 = vld [vmem:[#allocation4 + $0x148] sm:$0xff]   ;;  %v1471_v48 = vld [vmem:[#allocation4 + $0x150] sm:$0xff]  }
  0x44   :  { %1185 = vmatpush3.bf16.msra.mxu0 %v1444_v13  ;;  %v1466_v43 = vld [vmem:[#allocation4 + $0x180] sm:$0xff]   ;;  %v1468_v45 = vld [vmem:[#allocation4 + $0x108] sm:$0xff]   ;;  %v1472_v49 = vld [vmem:[#allocation4 + $0x110] sm:$0xff]  }
  0x45   :  { %1186 = vmatprep.subr.bf16.mxu0 %v1447_v16  ;;  %697 = vmatprep.mubr.bf16.mxu1 %v66_v38  ;;  %v1469_v46 = vld [vmem:[#allocation4 + $0x1c8] sm:$0xff]   ;;  %v1473_v50 = vld [vmem:[#allocation4 + $0x1d0] sm:$0xff]   ;;  %v1475_v52 = vld [vmem:[#allocation4 + $0x158] sm:$0xff]  }
  0x46   :  { %1207 = vmatpush3.bf16.msra.mxu1 %v1446_v15  ;;  %v1470_v47 = vld [vmem:[#allocation4 + $0x188] sm:$0xff]   ;;  %v1474_v51 = vld [vmem:[#allocation4 + $0x190] sm:$0xff]   ;;  %v1476_v53 = vld [vmem:[#allocation4 + $0x118] sm:$0xff]  }
  0x47   :  { %1208 = vmatprep.subr.bf16.mxu1 %v1449_v18  ;;  %v1477_v54 = vld [vmem:[#allocation4 + $0x1d8] sm:$0xff]   ;;  %v1479_v56 = vld [vmem:[#allocation4 + $0x160] sm:$0xff]   ;;  %v1483_v60 = vld [vmem:[#allocation4 + $0x168] sm:$0xff]  }
  0x48   :  { %1187 = vmatpush3.bf16.msra.mxu0 %v1448_v17  ;;  %v1478_v55 = vld [vmem:[#allocation4 + $0x198] sm:$0xff]   ;;  %v1480_v57 = vld [vmem:[#allocation4 + $0x120] sm:$0xff]   ;;  %v1484_v61 = vld [vmem:[#allocation4 + $0x128] sm:$0xff]  }
  0x49   :  { %1188 = vmatprep.subr.bf16.mxu0 %v1451_v20  ;;  %v1481_v58 = vld [vmem:[#allocation4 + $0x1e0] sm:$0xff]   ;;  %v1485_v62 = vld [vmem:[#allocation4 + $0x1e8] sm:$0xff]   ;;  %v1487_v0 = vld [vmem:[#allocation4 + $0x170] sm:$0xff]  }
  0x4a   :  { %1209 = vmatpush3.bf16.msra.mxu1 %v1450_v19  ;;  %v1482_v59 = vld [vmem:[#allocation4 + $0x1a0] sm:$0xff]   ;;  %v1486_v63 = vld [vmem:[#allocation4 + $0x1a8] sm:$0xff]   ;;  %v1488_v1 = vld [vmem:[#allocation4 + $0x130] sm:$0xff]  }
  0x4b   :  { %1210 = vmatprep.subr.bf16.mxu1 %v1453_v22  ;;  %v1489_v2 = vld [vmem:[#allocation4 + $0x1f0] sm:$0xff]   ;;  %v1491_v4 = vld [vmem:[#allocation4 + $0x178] sm:$0xff]   ;;  %v59_v7 = vld [vmem:[#allocation2 + $0x28] sm:$0xff] }
  0x4c   :  { %1189 = vmatpush3.bf16.msra.mxu0 %v1452_v21  ;;  %v1490_v3 = vld [vmem:[#allocation4 + $0x1b0] sm:$0xff]   ;;  %v1492_v5 = vld [vmem:[#allocation4 + $0x138] sm:$0xff]   ;;  %v68_v8 = vpack.c.bf16 %v59_v7, %v59_v7  ;;  %v1495_v15 = vld [vmem:[#allocation4 + $0x200] sm:$0xff]  }
  0x4d   :  { %1190 = vmatprep.subr.bf16.mxu0 %v1455_v24  ;;  %v1493_v6 = vld [vmem:[#allocation4 + $0x1f8] sm:$0xff]   ;;  %v61_v13 = vld [vmem:[#allocation2 + $0x38] sm:$0xff]  ;;  %v60_v16 = vld [vmem:[#allocation2 + $0x30] sm:$0xff] }
  0x4e   :  { %1211 = vmatpush3.bf16.msra.mxu1 %v1454_v23  ;;  %v1494_v9 = vld [vmem:[#allocation4 + $0x1b8] sm:$0xff]   ;;  %v70_v14 = vpack.c.bf16 %v61_v13, %v61_v13  ;;  %v69_v17 = vpack.c.bf16 %v60_v16, %v60_v16  ;;  %v1496_v18 = vld [vmem:[#allocation4 + $0x208] sm:$0xff]   ;;  %v1497_v19 = vld [vmem:[#allocation4 + $0x210] sm:$0xff]  }
  0x4f   :  { %1212 = vmatprep.subr.bf16.mxu1 %v1457_v26  ;;  %v58_v10 = vld [vmem:[#allocation2 + $0x20] sm:$0xff]  ;;  %v830_v26 = vld [vmem:[#allocation6 + $0x10] sm:$0xff]  ;;  %v833_v32 = vld [vmem:[#allocation6 + $0x28] sm:$0xff] }
  0x50   :  { %1191 = vmatpush3.bf16.msra.mxu0 %v1456_v25  ;;  %v67_v11 = vpack.c.bf16 %v58_v10, %v58_v10  ;;  %v1498_v20 = vld [vmem:[#allocation4 + $0x218] ss:$0 sps:$4 sm:$0xff]   ;;  %v828_v24 = vld [vmem:[#allocation6] sm:$0xff]  ;;  %v829_v25 = vld [vmem:[#allocation6 + $0x8] sm:$0xff] }
  0x51   :  { %1192 = vmatprep.subr.bf16.mxu0 %v1459_v28  ;;  %v62_v21 = vld [vmem:[#allocation2 + $0x40] sm:$0xff]  ;;  %v623_v22 = vsel %vm621_vm1, %v1498_v20, 0  ;;  %v1380_v28 = vpack.c.bf16 %v829_v25, %v828_v24  ;;  %v834_v34 = vld [vmem:[#allocation6 + $0x30] sm:$0xff]  ;;  %v837_v38 = vld [vmem:[#allocation6 + $0x48] sm:$0xff] }
  0x52   :  { %1213 = vmatpush3.bf16.msra.mxu1 %v1458_v27  ;;  %v71_v23 = vpack.c.bf16 %v62_v21, %v62_v21  ;;  %v1578_v27 = vmov 0.0|0.0   ;;  %v832_v31 = vld [vmem:[#allocation6 + $0x20] sm:$0xff]  ;;  %v838_v40 = vld [vmem:[#allocation6 + $0x50] sm:$0xff] }
  0x53   :  { %1214 = vmatprep.subr.bf16.mxu1 %v1461_v30  ;;  %v836_v37 = vld [vmem:[#allocation6 + $0x40] sm:$0xff] }
  0x54   :  { %1193 = vmatpush3.bf16.msra.mxu0 %v1460_v29  ;;  %v831_v29 = vld [vmem:[#allocation6 + $0x18] sm:$0xff] }
  0x55   :  { %1222 = vmatprep.subr.bf16.mxu0 %v1463_v36  ;;  %v1383_v30 = vpack.c.bf16 %v831_v29, %v830_v26  ;;  %v929_v29 = vld [vmem:[#allocation6 + $0xb8] sm:$0xff] }
  0x56   :  { %1215 = vmatpush3.bf16.msra.mxu1 %v1462_v33  ;;  %v1386_v33 = vpack.c.bf16 %v833_v32, %v832_v31  ;;  %v1173_v31 = vld [vmem:[#allocation6 + $0xe8] ss:$0 sm:$0xff] }
  0x57   :  { %658 = vmatmul.mubr.bf16.vlgmr.msra.gmra.mrb[0].mxu0 %v63_v35  ;;  %1244 = vmatprep.subr.bf16.mxu1 %v1465_v42  ;;  %v835_v35 = vld [vmem:[#allocation6 + $0x38] sm:$0xff] }
  0x58   :  { %1223 = vmatpush3.bf16.msra.mxu0 %v1464_v39  ;;  %737 = vmatprep.mubr.bf16.mxu0 %v68_v8  ;;  %v1389_v36 = vpack.c.bf16 %v835_v35, %v834_v34  ;;  %v1392_v39 = vpack.c.bf16 %v837_v38, %v836_v37  ;;  %v1013_v34 = vld [vmem:[#allocation6 + $0xc8] sm:$0xff] }
  0x59   :  { %698 = vmatmul.mubr.bf16.vlgmr.msra.gmra.mrb[0].mxu1 %v65_v41  ;;  %1224 = vmatprep.subr.bf16.mxu0 %v1467_v44  ;;  %v839_v41 = vld [vmem:[#allocation6 + $0x58] sm:$0xff]  ;;  %v841_v44 = vld [vmem:[#allocation6 + $0x68] sm:$0xff] }
  0x5a   :  { %1245 = vmatpush3.bf16.msra.mxu1 %v1466_v43  ;;  %777 = vmatprep.mubr.bf16.mxu1 %v70_v14  ;;  %v1395_v42 = vpack.c.bf16 %v839_v41, %v838_v40  ;;  %v840_v43 = vld [vmem:[#allocation6 + $0x60] sm:$0xff]  ;;  %v1014_v40 = vld [vmem:[#allocation6 + $0xd0] sm:$0xff]  ;;  %v1015_v41 = vld [vmem:[#allocation6 + $0xd8] sm:$0xff] }
  0x5b   :  { %1246 = vmatprep.subr.bf16.mxu1 %v1469_v46  ;;  %v842_v46 = vld [vmem:[#allocation6 + $0x70] sm:$0xff] }
  0x5c   :  { %1225 = vmatpush3.bf16.msra.mxu0 %v1468_v45  ;;  %v1398_v45 = vpack.c.bf16 %v841_v44, %v840_v43  ;;  %v1174_v43 = vld [vmem:[#allocation6 + $0xf0] ss:$0 sm:$0xff] }
  0x5d   :  { %1226 = vmatprep.subr.bf16.mxu0 %v1471_v48 }
  0x5e   :  { %1247 = vmatpush3.bf16.msra.mxu1 %v1470_v47  ;;  %v843_v47 = vld [vmem:[#allocation6 + $0x78] sm:$0xff] }
  0x5f   :  { %1248 = vmatprep.subr.bf16.mxu1 %v1473_v50  ;;  %v1401_v48 = vpack.c.bf16 %v843_v47, %v842_v46  ;;  %v923_v50 = vld [vmem:[#allocation6 + $0x88] sm:$0xff] }
  0x60   :  { %1227 = vmatpush3.bf16.msra.mxu0 %v1472_v49  ;;  %v922_v49 = vld [vmem:[#allocation6 + $0x80] sm:$0xff] }
  0x61   :  { %1228 = vmatprep.subr.bf16.mxu0 %v1475_v52  ;;  %v1404_v52 = vpack.c.bf16 %v923_v50, %v922_v49  ;;  %v1176_v49 = vld [vmem:[#allocation6 + $0xf8] ss:$0 sm:$0xff] }
  0x62   :  { %1249 = vmatpush3.bf16.msra.mxu1 %v1474_v51  ;;  %v924_v51 = vld [vmem:[#allocation6 + $0x90] sm:$0xff] }
  0x63   :  { %1250 = vmatprep.subr.bf16.mxu1 %v1477_v54 }
  0x64   :  { %1229 = vmatpush3.bf16.msra.mxu0 %v1476_v53  ;;  %v925_v53 = vld [vmem:[#allocation6 + $0x98] sm:$0xff] }
  0x65   :  { %1230 = vmatprep.subr.bf16.mxu0 %v1479_v56  ;;  %v1407_v54 = vpack.c.bf16 %v925_v53, %v924_v51  ;;  %v927_v56 = vld [vmem:[#allocation6 + $0xa8] sm:$0xff] }
  0x66   :  { %1251 = vmatpush3.bf16.msra.mxu1 %v1478_v55  ;;  %v926_v55 = vld [vmem:[#allocation6 + $0xa0] sm:$0xff] }
  0x67   :  { %1252 = vmatprep.subr.bf16.mxu1 %v1481_v58 }
  0x68   :  { %1231 = vmatpush3.bf16.msra.mxu0 %v1480_v57  ;;  %v1410_v57 = vpack.c.bf16 %v927_v56, %v926_v55 }
  0x69   :  { %1232 = vmatprep.subr.bf16.mxu0 %v1483_v60 }
  0x6a   :  { %1253 = vmatpush3.bf16.msra.mxu1 %v1482_v59  ;;  %v1103_v59 = vld [vmem:[#allocation6 + $0xe0] ss:$0 sm:$0xff] }
  0x6b   :  { %1254 = vmatprep.subr.bf16.mxu1 %v1485_v62 }
  0x6c   :  { %1233 = vmatpush3.bf16.msra.mxu0 %v1484_v61 }
  0x6d   :  { %1234 = vmatprep.subr.bf16.mxu0 %v1487_v0 }
  0x6e   :  { %1255 = vmatpush3.bf16.msra.mxu1 %v1486_v63 }
  0x6f   :  { %1256 = vmatprep.subr.bf16.mxu1 %v1489_v2 }
  0x70   :  { %1235 = vmatpush3.bf16.msra.mxu0 %v1488_v1 }
  0x71   :  { %1236 = vmatprep.subr.bf16.mxu0 %v1491_v4 }
  0x72   :  { %1257 = vmatpush3.bf16.msra.mxu1 %v1490_v3 }
  0x73   :  { %1258 = vmatprep.subr.bf16.mxu1 %v1493_v6 }
  0x74   :  { %1237 = vmatpush3.bf16.msra.mxu0 %v1492_v5 }
  0x75   :  { %1302 = vmatprep.subr.bf16.mxu0 %v1576_v12 }
  0x76   :  { %1259 = vmatpush3.bf16.msra.mxu1 %v1494_v9 }
  0x77   :  { %738 = vmatmul.mubr.bf16.vlgmr.msra.gmra.mrb[4].mxu0 %v67_v11  ;;  %1379 = vmatprep.subr.bf16.mxu1 %v1578_v27 }
  0x78   :  { %1303 = vmatpush3.bf16.msra.mxu0 %v1495_v15  ;;  %1310 = vmatprep.mubr.msk.bf16.mxu0 %vm1577_vm0, %v1576_v12 }
  0x79   :  { %778 = vmatmul.mubr.bf16.vlgmr.msra.gmra.mrb[4].mxu1 %v69_v17  ;;  %1304 = vmatprep.subr.bf16.mxu0 %v1576_v12 }
  0x7a   :  { %1346 = vmatprep.mubr.msk.f32.mxu1 %vm1577_vm0, %v1576_v12  ;;  %1381 = vmatpush3.bf16.msra.mxu1 %v1380_v28  ;;  %v928_v28 = vld [vmem:[#allocation6 + $0xb0] sm:$0xff] }
  0x7b   :  { %1382 = vmatprep.subr.bf16.mxu1 %v1578_v27 }
  0x7c   :  { %1305 = vmatpush3.bf16.msra.mxu0 %v1496_v18 }
  0x7d   :  { %1306 = vmatprep.subr.bf16.mxu0 %v1576_v12 }
  0x7e   :  { %1384 = vmatpush3.bf16.msra.mxu1 %v1383_v30  ;;  %v1413_v30 = vpack.c.bf16 %v929_v29, %v928_v28 }
  0x7f   :  { %1385 = vmatprep.subr.bf16.mxu1 %v1578_v27 }
  0x80   :  { %1307 = vmatpush3.bf16.msra.mxu0 %v1497_v19 }
  0x81   :  { %1308 = vmatprep.subr.bf16.mxu0 %v1576_v12 }
  0x82   :  { %1387 = vmatpush3.bf16.msra.mxu1 %v1386_v33  ;;  %v1012_v33 = vld [vmem:[#allocation6 + $0xc0] sm:$0xff] }
  0x83   :  { %1388 = vmatprep.subr.bf16.mxu1 %v1578_v27  ;;  %v1416_v38 = vpack.c.bf16 %v1013_v34, %v1012_v33 }
  0x84   :  { %1309 = vmatpush3.bf16.msra.mxu0 %v623_v22 }
  0x85   :  { %1403 = vmatprep.subr.bf16.mxu0 %v1578_v27 }
  0x86   :  { %1390 = vmatpush3.bf16.msra.mxu1 %v1389_v36 }
  0x87   :  { %1311 = vmatmul.mubr.msk.bf16.vlgmr.msra.gmra.mrb[8].mxu0 %vm617_vm2, %v71_v23  ;;  %1391 = vmatprep.subr.bf16.mxu1 %v1578_v27 }
  0x88   :  { %1365 = vmatprep.mubr.msk.f32.mxu0 %vm1577_vm0, %v1576_v12  ;;  %1405 = vmatpush3.bf16.msra.mxu0 %v1404_v52 }
  0x89   :  { %1406 = vmatprep.subr.bf16.mxu0 %v1578_v27 }
  0x8a   :  { %1393 = vmatpush3.bf16.msra.mxu1 %v1392_v39 }
  0x8b   :  { %1394 = vmatprep.subr.bf16.mxu1 %v1578_v27 }
  0x8c   :  { %1408 = vmatpush3.bf16.msra.mxu0 %v1407_v54 }
  0x8d   :  { %1409 = vmatprep.subr.bf16.mxu0 %v1578_v27 }
  0x8e   :  { %1396 = vmatpush3.bf16.msra.mxu1 %v1395_v42  ;;  %v1419_v42 = vpack.c.bf16 %v1015_v41, %v1014_v40 }
  0x8f   :  { %1397 = vmatprep.subr.bf16.mxu1 %v1578_v27 }
  0x90   :  { %1411 = vmatpush3.bf16.msra.mxu0 %v1410_v57 }
  0x91   :  { %1412 = vmatprep.subr.bf16.mxu0 %v1578_v27 }
  0x92   :  { %1399 = vmatpush3.bf16.msra.mxu1 %v1398_v45 }
  0x93   :  { %1400 = vmatprep.subr.bf16.mxu1 %v1578_v27 }
  0x94   :  { %1414 = vmatpush3.bf16.msra.mxu0 %v1413_v30 }
  0x95   :  { %1415 = vmatprep.subr.bf16.mxu0 %v1578_v27 }
  0x96   :  { %1402 = vmatpush3.bf16.msra.mxu1 %v1401_v48 }
 0x12a   :  { %v1194_v58 = vpop.f32.mrb[0].mxu0 }
 0x12b   :  { %v1195_v60 = vpop.f32.mrb[1].mxu0 }
 0x12c   :  { %v1196_v61 = vadd.f32 %v1195_v60, %v1194_v58  ;;  %v1197_v62 = vpop.f32.mrb[2].mxu0  ;;  %v1216_v63 = vpop.f32.mrb[0].mxu1 }
 0x12d   :  { %v1198_v0 = vpop.f32.mrb[3].mxu0  ;;  %v1217_v2 = vpop.f32.mrb[1].mxu1 }
 0x12e   :  { %v660_v1 = vadd.f32 %v1196_v61, %v1103_v59  ;;  %v1218_v3 = vadd.f32 %v1217_v2, %v1216_v63  ;;  %v1219_v4 = vpop.f32.mrb[2].mxu1 }
 0x12f   :  { %v1220_v5 = vpop.f32.mrb[3].mxu1 }
 0x130   :  { %v700_v6 = vadd.f32 %v1218_v3, %v660_v1 }
 0x14a   :  { %v1238_v7 = vpop.f32.mrb[4].mxu0 }
 0x14b   :  { %v1239_v8 = vpop.f32.mrb[5].mxu0 }
 0x14c   :  { %v1240_v9 = vadd.f32 %v1239_v8, %v1238_v7  ;;  %v1241_v10 = vpop.f32.mrb[6].mxu0  ;;  %v1260_v11 = vpop.f32.mrb[4].mxu1 }
 0x14d   :  { %v1242_v13 = vpop.f32.mrb[7].mxu0  ;;  %v1261_v14 = vpop.f32.mrb[5].mxu1 }
 0x14e   :  { %v740_v15 = vadd.f32 %v1240_v9, %v700_v6  ;;  %v1262_v16 = vadd.f32 %v1261_v14, %v1260_v11  ;;  %v1263_v17 = vpop.f32.mrb[6].mxu1 }
 0x14f   :  { %v1264_v18 = vpop.f32.mrb[7].mxu1 }
 0x150   :  { %v780_v19 = vadd.f32 %v1262_v16, %v740_v15 }
 0x15a   :  { %v819_v20 = vpop.f32.mrb[8].mxu0 }
 0x15b   :  { %v820_v21 = vadd.f32 %v819_v20, %v780_v19  ;;  %v1312_v22 = vpop.f32.mrb[9].mxu0 }
 0x15c   :  { %v822_v23 = vpop.f32.mrb[10].mxu0 }
 0x15d   :  { %vm825_vm3 = vcmp.gt.f32.partialorder %v820_v21, 0.0  ;;  %v826_v24 = vmul.f32 0.2, %v820_v21  ;;  %v1313_v25 = vpop.f32.mrb[11].mxu0 }
 0x15f   :  { %v827_v26 = vsel %vm825_vm3, %v820_v21, %v826_v24 }
 0x160   :  { %1347 = vmatmul.mubr.f32.vlgmr.msra.gmra.mrb[8].mxu1 %v827_v26 }
 0x233   :  { %v915_v32 = vpop.f32.mrb[8].mxu1 }
 0x234   :  { %v916_v35 = vadd.f32 %v1173_v31, %v915_v32  ;;  %v1348_v36 = vpop.f32.mrb[9].mxu1 }
 0x236   :  { %vm919_vm4 = vcmp.gt.f32.partialorder %v916_v35, 0.0  ;;  %v920_v37 = vmul.f32 0.2, %v916_v35 }
 0x238   :  { %v921_v39 = vsel %vm919_vm4, %v916_v35, %v920_v37 }
 0x239   :  { %1366 = vmatmul.mubr.msk.f32.vlgmr.msra.gmra.mrb[12].mxu0 %vm935_vm5, %v921_v39 }
 0x23a   :  { %1417 = vmatpush3.bf16.msra.mxu0 %v1416_v38  ;;  %1376 = vmatprep.mubr.msk.f32.mxu0 %vm1577_vm0, %v1576_v12 }
 0x23b   :  { %1418 = vmatprep.subr.bf16.mxu0 %v1578_v27 }
 0x23e   :  { %1420 = vmatpush3.bf16.msra.mxu0 %v1419_v42 }
 0x30c   :  { %v1005_v44 = vpop.f32.mrb[12].mxu0 }
 0x30d   :  { %v1006_v45 = vadd.f32 %v1174_v43, %v1005_v44  ;;  %v1367_v46 = vpop.f32.mrb[13].mxu0 }
 0x30f   :  { %vm1009_vm6 = vcmp.gt.f32.partialorder %v1006_v45, 0.0  ;;  %v1010_v47 = vmul.f32 0.2, %v1006_v45 }
 0x311   :  { %v1011_v48 = vsel %vm1009_vm6, %v1006_v45, %v1010_v47 }
 0x312   :  { %1377 = vmatmul.mubr.msk.f32.vlgmr.msra.gmra.mrb[14].mxu0 %vm1021_vm7, %v1011_v48 }
 0x3e5   :  { %v1091_v50 = vpop.f32.mrb[14].mxu0 }
 0x3e6   :  { %v1092_v51 = vadd.f32 %v1176_v49, %v1091_v50  ;;  %v1378_v52 = vpop.f32.mrb[15].mxu0 }
 0x3e8   :  { %v1095_v12 = vpack.c.bf16 %v1092_v51, %v1092_v51 }
 0x3ea   :  { %1096 = vst [vmem:[%s1667_s3] sm:$0xf] %v1095_v12 }
 0x3eb   :  { %1101 = vsyncpa [#allocation3], 1 }
 0x3ec   :  { %1102 = vsyncpa [#allocation5], 1 }

</bundles_post_ra>
